<compile_context>
chip_gen: v7x
topology: tpu7x:2x2x1
jax: 0.10.0
libtpu: 0.0.40
codegen_flags: <defaults>
</compile_context>

<pallas_src>
import functools

import jax
import jax.numpy as jnp
from jax import lax
from jax.experimental import pallas as pl
from jax.experimental.pallas import tpu as pltpu


def _round_up(x, m):
    return ((x + m - 1) // m) * m


def _cdiv(a, b):
    return -(-a // b)


def _even_tile(size, max_tile, align):
    """Largest roughly-even split of `size` into tiles <= max_tile, aligned."""
    ntiles = max(1, _cdiv(size, max_tile))
    return _round_up(_cdiv(size, ntiles), align)


def _vmem_capacity_bytes():
    try:
        cap = getattr(pltpu.get_tpu_info(), "vmem_capacity_bytes", None)
        if cap:
            return int(cap)
    except Exception:
        pass
    return 64 * 1024 * 1024   # conservative fallback (v7x per-TC physical)


def _fact_attention_body(enc_ref, fact_ref, out_ref, w_ref, m_sc, l_sc, acc_sc,
                         *, gn, tn, n_true, needs_mask, has_weights):
    """One (M-tile, pass, N-tile) grid step of streamed fact attention."""
    p_id = pl.program_id(1)   # 0: online-softmax / accumulate, 1: weights pass
    j = pl.program_id(2)      # fact (N) tile index

    enc = enc_ref[...]        # [tm, D]
    fact = fact_ref[...]      # [tn, D]  (reused for both matmuls in pass 0)

    # Energy tile: contract over D directly (no materialized fact.T).
    s = lax.dot_general(enc, fact, (((1,), (1,)), ((), ())),
                        preferred_element_type=jnp.float32)       # [tm, tn] f32
    if needs_mask:
        col = j * tn + lax.broadcasted_iota(jnp.int32, s.shape, 1)
        s = jnp.where(col < n_true, s, jnp.float32(-1e30))

    acc_is_out = acc_sc is None   # f32 outputs accumulate straight into out_ref

    def _read_acc():
        return out_ref[...] if acc_is_out else acc_sc[...]

    def _write_acc(v):
        if acc_is_out:
            out_ref[...] = v
        else:
            acc_sc[...] = v

    if has_weights:
        init_cond = jnp.logical_and(p_id == 0, j == 0)
        fin_cond = jnp.logical_and(p_id == 0, j == gn - 1)
    else:
        init_cond = j == 0
        fin_cond = j == gn - 1

    @pl.when(init_cond)
    def _init():
        m_sc[...] = jnp.full_like(m_sc, -1e30)
        l_sc[...] = jnp.zeros_like(l_sc)
        _write_acc(jnp.zeros(out_ref.shape, jnp.float32))

    def _update():
        # Online (flash-style) softmax update over the N reduction axis.
        m_prev = m_sc[...]
        m_new = jnp.maximum(m_prev, jnp.max(s, axis=1, keepdims=True))
        alpha = jnp.exp(m_prev - m_new)
        pmat = jnp.exp(s - m_new)
        l_sc[...] = alpha * l_sc[...] + jnp.sum(pmat, axis=1, keepdims=True)
        _write_acc(alpha * _read_acc()
                   + jnp.dot(pmat.astype(fact.dtype), fact,
                             preferred_element_type=jnp.float32))
        m_sc[...] = m_new

    if has_weights:
        pl.when(p_id == 0)(_update)
    else:
        _update()

    @pl.when(fin_cond)
    def _finalize():
        inv_l = pl.reciprocal(l_sc[...], approx=False)            # [tm, 1]
        out_ref[...] = (_read_acc() * inv_l).astype(out_ref.dtype)
        if has_weights:
            l_sc[...] = inv_l   # reused as 1/l by the weights pass

    if has_weights:
        @pl.when(p_id == 1)
        def _weights():
            # Recomputed energy, normalized with the final m and 1/l from pass 0.
            w_ref[...] = (jnp.exp(s - m_sc[...]) * l_sc[...]).astype(w_ref.dtype)


def _make_kernel(has_weights, needs_acc, **static):
    def kernel(*refs):
        enc_ref, fact_ref, out_ref = refs[:3]
        pos = 3
        w_ref = None
        if has_weights:
            w_ref = refs[pos]
            pos += 1
        m_sc, l_sc = refs[pos], refs[pos + 1]
        pos += 2
        acc_sc = refs[pos] if needs_acc else None
        _fact_attention_body(enc_ref, fact_ref, out_ref, w_ref, m_sc, l_sc,
                             acc_sc, has_weights=has_weights, **static)
    return kernel


def fact_attention(encoder_outputs, fact_emb, *, return_weights=True,
                   tile_m=None, tile_n=None, compute_dtype=None):
    """outputs = softmax(enc @ fact.T, axis=1) @ fact ; optionally also weights."""
    M, D = encoder_outputs.shape
    N, D2 = fact_emb.shape
    assert D == D2, "hidden dims must match"
    out_dtype = jnp.dtype(encoder_outputs.dtype)
    in_dtype = jnp.dtype(compute_dtype) if compute_dtype is not None else out_dtype
    in_item = in_dtype.itemsize
    out_item = out_dtype.itemsize
    needs_acc = out_dtype != jnp.dtype(jnp.float32)   # bf16 etc. keep f32 scratch acc

    if tile_m is None:
        # bf16 outputs-only is HBM-bound at tm=256 on v6e -> taller tile.
        tile_m = 512 if (in_item <= 2 and not return_weights) else 256
    if tile_n is None:
        tile_n = 512

    tm = _even_tile(M, tile_m, 8)
    tn = _even_tile(N, tile_n, 128)

    # Give the 'parallel' M axis at least two tiles so v7x's two TensorCores
    # (and megacore) have something to split.
    if _round_up(M, tm) // tm == 1 and M > 128:
        tm = _round_up(_cdiv(M, 2), 8)

    # Per-generation VMEM budget with headroom; shrink tiles (not just the
    # scoped limit) until the real footprint fits.
    cap = _vmem_capacity_bytes()
    budget = int(cap * 0.75)

    def _footprint(tm_, tn_):
        f = 2 * tm_ * D * in_item           # enc block (double-buffered)
        f += 2 * tn_ * D * in_item          # fact block
        f += 2 * tm_ * D * out_item         # outputs block
        if return_weights:
            f += 2 * tm_ * tn_ * out_item   # streamed weights block
        f += 2 * tm_ * 128 * 4              # m / l scratch (lane padded)
        if needs_acc:
            f += tm_ * D * 4                # f32 accumulator scratch
        return f

    while _footprint(tm, tn) > budget and (tn > 128 or tm > 8):
        if tn > 128:
            tn = max(128, _round_up(tn // 2, 128))
        else:
            tm = max(8, _round_up(tm // 2, 8))
    # TODO(synk): chunk D in the energy contraction for very large hidden dims
    # instead of only shrinking tm/tn.

    Mp = _round_up(M, tm)
    Np = _round_up(N, tn)
    gm, gn = Mp // tm, Np // tn
    needs_mask = (Np != N)
    n_pass = 2 if return_weights else 1

    enc_p = encoder_outputs
    fact_p = fact_emb
    if Mp != M:
        enc_p = jnp.pad(enc_p, ((0, Mp - M), (0, 0)))
    if Np != N:
        fact_p = jnp.pad(fact_p, ((0, Np - N), (0, 0)))
    if in_dtype != out_dtype:
        enc_p = enc_p.astype(in_dtype)
        fact_p = fact_p.astype(in_dtype)

    # TODO(synk): pipeline_mode=pl.Buffered(1) on the resident enc/out blocks
    # would reclaim one VMEM buffer each once single-buffering revisited blocks
    # is verified safe on the installed Pallas.
    in_specs = [
        pl.BlockSpec((tm, D), lambda i, p, j: (i, 0)),   # enc: resident per M tile
        pl.BlockSpec((tn, D), lambda i, p, j: (j, 0)),   # fact: streamed over N
    ]
    out_spec_o = pl.BlockSpec((tm, D), lambda i, p, j: (i, 0))

    scratch = [pltpu.VMEM((tm, 1), jnp.float32),   # running row max
               pltpu.VMEM((tm, 1), jnp.float32)]   # running row sum -> 1/l
    if needs_acc:
        scratch.append(pltpu.VMEM((tm, D), jnp.float32))

    kernel = _make_kernel(return_weights, needs_acc, gn=gn, tn=tn, n_true=N,
                          needs_mask=needs_mask)

    if return_weights:
        out_shape = (jax.ShapeDtypeStruct((Mp, D), out_dtype),
                     jax.ShapeDtypeStruct((Mp, Np), out_dtype))
        out_specs = (out_spec_o,
                     # pass 0: parked on (i, 0); pass 1: streamed (i, j) tiles.
                     pl.BlockSpec((tm, tn), lambda i, p, j: (i, j * p)))
    else:
        out_shape = jax.ShapeDtypeStruct((Mp, D), out_dtype)
        out_specs = out_spec_o

    footprint = _footprint(tm, tn)
    vmem_limit = int(min(max(footprint * 2, 32 * 1024 * 1024), int(cap * 0.9)))
    vmem_limit = max(vmem_limit, int(footprint * 1.25))

    flops = 2 * Mp * Np * D * (n_pass + 1)     # energy per pass + pass-0 p@fact
    transcendentals = Mp * Np * n_pass
    bytes_accessed = (Mp * D * in_item                      # enc (read once per i)
                      + gm * n_pass * Np * D * in_item      # fact re-read per tile/pass
                      + Mp * D * out_item                   # outputs
                      + (Mp * Np * out_item if return_weights else 0))

    result = pl.pallas_call(
        kernel,
        out_shape=out_shape,
        grid_spec=pltpu.PrefetchScalarGridSpec(
            num_scalar_prefetch=0,
            grid=(gm, n_pass, gn),
            in_specs=in_specs,
            out_specs=out_specs,
            scratch_shapes=scratch,
        ),
        compiler_params=pltpu.CompilerParams(
            dimension_semantics=("parallel", "arbitrary", "arbitrary"),
            vmem_limit_bytes=vmem_limit,
        ),
        cost_estimate=pl.CostEstimate(
            flops=flops,
            transcendentals=transcendentals,
            bytes_accessed=bytes_accessed,
        ),
    )(enc_p, fact_p)

    if return_weights:
        out_p, w_p = result
        return out_p[:M], w_p[:M, :N]
    return result[:M]


def fact_attention_ref(encoder_outputs, fact_emb):
    energy = encoder_outputs @ fact_emb.T
    weights = jax.nn.softmax(energy, axis=1)
    outputs = weights @ fact_emb
    return outputs, weights


if __name__ == "__main__":
    k_enc, k_fact, k_enc2, k_fact2 = jax.random.split(jax.random.PRNGKey(0), 4)

    # Small shapes consistent with the module: M encoder steps, N facts, D hidden.
    M, N, D = 8, 16, 32
    enc = jax.random.normal(k_enc, (M, D), dtype=jnp.float32)
    fact = jax.random.normal(k_fact, (N, D), dtype=jnp.float32)

    outputs, weights = fact_attention(enc, fact)
    outputs = jax.block_until_ready(outputs)
    weights = jax.block_until_ready(weights)

    ref_out, ref_w = fact_attention_ref(enc, fact)
    assert outputs.shape == (M, D) and weights.shape == (M, N)
    assert jnp.allclose(outputs, ref_out, atol=1e-5, rtol=1e-5)
    assert jnp.allclose(weights, ref_w, atol=1e-5, rtol=1e-5)

    # Exercise the tiled / padded / masked multi-block, two-pass weights path.
    M2, N2, D2 = 260, 700, 64
    enc2 = jax.random.normal(k_enc2, (M2, D2), dtype=jnp.float32)
    fact2 = jax.random.normal(k_fact2, (N2, D2), dtype=jnp.float32)

    out2, w2 = fact_attention(enc2, fact2)
    out2 = jax.block_until_ready(out2)
    w2 = jax.block_until_ready(w2)
    ref_out2, ref_w2 = fact_attention_ref(enc2, fact2)
    assert out2.shape == (M2, D2) and w2.shape == (M2, N2)
    assert jnp.allclose(out2, ref_out2, atol=1e-4, rtol=1e-4)
    assert jnp.allclose(w2, ref_w2, atol=1e-4, rtol=1e-4)

    # Outputs-only fast path (single pass, no [M, N] writeback at all).
    out3 = jax.block_until_ready(fact_attention(enc2, fact2, return_weights=False))
    assert jnp.allclose(out3, ref_out2, atol=1e-4, rtol=1e-4)

    print("KERNEL_OK")
</pallas_src>

<mosaic_0001>
module attributes {stable_mosaic.version = 11 : i64} {
  func.func @kernel(%arg0: i32, %arg1: i32, %arg2: i32, %arg3: memref<8x32xf32, #tpu.memory_space<vmem>>, %arg4: memref<128x32xf32, #tpu.memory_space<vmem>>, %arg5: memref<8x32xf32, #tpu.memory_space<vmem>>, %arg6: memref<8x128xf32, #tpu.memory_space<vmem>>, %arg7: memref<8x1xf32, #tpu.memory_space<vmem>>, %arg8: memref<8x1xf32, #tpu.memory_space<vmem>>) attributes {dimension_semantics = [#tpu.dimension_semantics<parallel>, #tpu.dimension_semantics<arbitrary>, #tpu.dimension_semantics<arbitrary>], iteration_bounds = array<i64: 1, 2, 1>, scalar_prefetch = 0 : i64, scratch_operands = 2 : i64, tpu.core_type = #tpu.core_type<tc>, window_params = [{transform_indices = @transform_0, window_bounds = array<i64: 8, 32>}, {transform_indices = @transform_1, window_bounds = array<i64: 128, 32>}, {transform_indices = @transform_2, window_bounds = array<i64: 8, 32>}, {transform_indices = @transform_3, window_bounds = array<i64: 8, 128>}]} {
    %c0 = arith.constant 0 : index
    %c0_0 = arith.constant 0 : index
    %0 = vector.load %arg3[%c0, %c0_0] : memref<8x32xf32, #tpu.memory_space<vmem>>, vector<8x32xf32>
    %c0_1 = arith.constant 0 : index
    %c0_2 = arith.constant 0 : index
    %1 = vector.load %arg4[%c0_1, %c0_2] : memref<128x32xf32, #tpu.memory_space<vmem>>, vector<128x32xf32>
    %cst = arith.constant dense<0.000000e+00> : vector<8x128xf32>
    %2 = tpu.matmul %0, %1, %cst {dimension_numbers = #tpu.dot_dimension_numbers<[1], [1], [0], [0], [0, 0, 1, 0], [], []>} : vector<8x32xf32>, vector<128x32xf32>, vector<8x128xf32> -> vector<8x128xf32>
    %c128_i32 = arith.constant 128 : i32
    %3 = arith.muli %arg2, %c128_i32 : i32
    %4 = tpu.iota {dimensions = array<i32: 1>} : vector<8x128xi32>
    %5 = vector.broadcast %3 : i32 to vector<8x128xi32>
    %6 = arith.addi %5, %4 : vector<8x128xi32>
    %c16_i32 = arith.constant 16 : i32
    %7 = vector.broadcast %c16_i32 : i32 to vector<8x128xi32>
    %8 = arith.cmpi slt, %6, %7 : vector<8x128xi32>
    %cst_3 = arith.constant -1.000000e+30 : f32
    %9 = vector.broadcast %cst_3 : f32 to vector<8x128xf32>
    %10 = arith.select %8, %2, %9 : vector<8x128xi1>, vector<8x128xf32>
    %c0_i32 = arith.constant 0 : i32
    %11 = arith.cmpi eq, %arg1, %c0_i32 : i32
    %c0_i32_4 = arith.constant 0 : i32
    %12 = arith.cmpi eq, %arg2, %c0_i32_4 : i32
    %13 = arith.andi %11, %12 : i1
    %c0_i32_5 = arith.constant 0 : i32
    %14 = arith.cmpi eq, %arg1, %c0_i32_5 : i32
    %c0_i32_6 = arith.constant 0 : i32
    %15 = arith.cmpi eq, %arg2, %c0_i32_6 : i32
    %16 = arith.andi %14, %15 : i1
    %17 = arith.extui %13 : i1 to i32
    %c0_i32_7 = arith.constant 0 : i32
    %18 = arith.cmpi ne, %17, %c0_i32_7 : i32
    scf.if %18 {
      %cst_12 = arith.constant -1.000000e+30 : f32
      %27 = vector.broadcast %cst_12 : f32 to vector<8x1xf32>
      %c0_13 = arith.constant 0 : index
      %c0_14 = arith.constant 0 : index
      %28 = vector.load %arg7[%c0_13, %c0_14] : memref<8x1xf32, #tpu.memory_space<vmem>>, vector<8x1xf32>
      tpu.vector_store %arg7[%c0_13, %c0_14], %27 {strides = array<i32>} : memref<8x1xf32, #tpu.memory_space<vmem>>, vector<8x1xf32>,
      %cst_15 = arith.constant 0.000000e+00 : f32
      %29 = vector.broadcast %cst_15 : f32 to vector<8x1xf32>
      %c0_16 = arith.constant 0 : index
      %c0_17 = arith.constant 0 : index
      %30 = vector.load %arg8[%c0_16, %c0_17] : memref<8x1xf32, #tpu.memory_space<vmem>>, vector<8x1xf32>
      tpu.vector_store %arg8[%c0_16, %c0_17], %29 {strides = array<i32>} : memref<8x1xf32, #tpu.memory_space<vmem>>, vector<8x1xf32>,
      %cst_18 = arith.constant 0.000000e+00 : f32
      %31 = vector.broadcast %cst_18 : f32 to vector<8x32xf32>
      %c0_19 = arith.constant 0 : index
      %c0_20 = arith.constant 0 : index
      %32 = vector.load %arg5[%c0_19, %c0_20] : memref<8x32xf32, #tpu.memory_space<vmem>>, vector<8x32xf32>
      tpu.vector_store %arg5[%c0_19, %c0_20], %31 {strides = array<i32>} : memref<8x32xf32, #tpu.memory_space<vmem>>, vector<8x32xf32>,
    } else {
    }
    %c0_i32_8 = arith.constant 0 : i32
    %19 = arith.cmpi eq, %arg1, %c0_i32_8 : i32
    %20 = arith.extui %19 : i1 to i32
    %c0_i32_9 = arith.constant 0 : i32
    %21 = arith.cmpi ne, %20, %c0_i32_9 : i32
    scf.if %21 {
      %c0_12 = arith.constant 0 : index
      %c0_13 = arith.constant 0 : index
      %27 = vector.load %arg7[%c0_12, %c0_13] : memref<8x1xf32, #tpu.memory_space<vmem>>, vector<8x1xf32>
      %cst_14 = arith.constant dense<0xFF800000> : vector<8xf32>
      %28 = vector.multi_reduction <maximumf>, %10, %cst_14 [1] : vector<8x128xf32> to vector<8xf32>
      %29 = vector.shape_cast %28 : vector<8xf32> to vector<8x1xf32>
      %30 = arith.maximumf %27, %29 : vector<8x1xf32>
      %31 = arith.subf %27, %30 : vector<8x1xf32>
      %32 = math.exp %31 : vector<8x1xf32>
      %33 = vector.broadcast %30 : vector<8x1xf32> to vector<8x128xf32>
      %34 = arith.subf %10, %33 : vector<8x128xf32>
      %35 = math.exp %34 : vector<8x128xf32>
      %c0_15 = arith.constant 0 : index
      %c0_16 = arith.constant 0 : index
      %36 = vector.load %arg8[%c0_15, %c0_16] : memref<8x1xf32, #tpu.memory_space<vmem>>, vector<8x1xf32>
      %37 = arith.mulf %32, %36 : vector<8x1xf32>
      %cst_17 = arith.constant dense<0.000000e+00> : vector<8xf32>
      %38 = vector.multi_reduction <add>, %35, %cst_17 [1] : vector<8x128xf32> to vector<8xf32>
      %39 = vector.shape_cast %38 : vector<8xf32> to vector<8x1xf32>
      %40 = arith.addf %37, %39 : vector<8x1xf32>
      %c0_18 = arith.constant 0 : index
      %c0_19 = arith.constant 0 : index
      %41 = vector.load %arg8[%c0_18, %c0_19] : memref<8x1xf32, #tpu.memory_space<vmem>>, vector<8x1xf32>
      tpu.vector_store %arg8[%c0_18, %c0_19], %40 {strides = array<i32>} : memref<8x1xf32, #tpu.memory_space<vmem>>, vector<8x1xf32>,
      %c0_20 = arith.constant 0 : index
      %c0_21 = arith.constant 0 : index
      %42 = vector.load %arg5[%c0_20, %c0_21] : memref<8x32xf32, #tpu.memory_space<vmem>>, vector<8x32xf32>
      %43 = vector.broadcast %32 : vector<8x1xf32> to vector<8x32xf32>
      %44 = arith.mulf %43, %42 : vector<8x32xf32>
      %cst_22 = arith.constant dense<0.000000e+00> : vector<8x32xf32>
      %45 = tpu.matmul %35, %1, %cst_22 {dimension_numbers = #tpu.dot_dimension_numbers<[1], [0], [0], [1], [0, 0, 1, 1], [], []>} : vector<8x128xf32>, vector<128x32xf32>, vector<8x32xf32> -> vector<8x32xf32>
      %46 = arith.addf %44, %45 : vector<8x32xf32>
      %c0_23 = arith.constant 0 : index
      %c0_24 = arith.constant 0 : index
      %47 = vector.load %arg5[%c0_23, %c0_24] : memref<8x32xf32, #tpu.memory_space<vmem>>, vector<8x32xf32>
      tpu.vector_store %arg5[%c0_23, %c0_24], %46 {strides = array<i32>} : memref<8x32xf32, #tpu.memory_space<vmem>>, vector<8x32xf32>,
      %c0_25 = arith.constant 0 : index
      %c0_26 = arith.constant 0 : index
      %48 = vector.load %arg7[%c0_25, %c0_26] : memref<8x1xf32, #tpu.memory_space<vmem>>, vector<8x1xf32>
      tpu.vector_store %arg7[%c0_25, %c0_26], %30 {strides = array<i32>} : memref<8x1xf32, #tpu.memory_space<vmem>>, vector<8x1xf32>,
    } else {
    }
    %22 = arith.extui %16 : i1 to i32
    %c0_i32_10 = arith.constant 0 : i32
    %23 = arith.cmpi ne, %22, %c0_i32_10 : i32
    scf.if %23 {
      %c0_12 = arith.constant 0 : index
      %c0_13 = arith.constant 0 : index
      %27 = vector.load %arg8[%c0_12, %c0_13] : memref<8x1xf32, #tpu.memory_space<vmem>>, vector<8x1xf32>
      %28 = tpu.reciprocal %27 : vector<8x1xf32> -> vector<8x1xf32>
      %c0_14 = arith.constant 0 : index
      %c0_15 = arith.constant 0 : index
      %29 = vector.load %arg5[%c0_14, %c0_15] : memref<8x32xf32, #tpu.memory_space<vmem>>, vector<8x32xf32>
      %30 = vector.broadcast %28 : vector<8x1xf32> to vector<8x32xf32>
      %31 = arith.mulf %29, %30 : vector<8x32xf32>
      %c0_16 = arith.constant 0 : index
      %c0_17 = arith.constant 0 : index
      %32 = vector.load %arg5[%c0_16, %c0_17] : memref<8x32xf32, #tpu.memory_space<vmem>>, vector<8x32xf32>
      tpu.vector_store %arg5[%c0_16, %c0_17], %31 {strides = array<i32>} : memref<8x32xf32, #tpu.memory_space<vmem>>, vector<8x32xf32>,
      %c0_18 = arith.constant 0 : index
      %c0_19 = arith.constant 0 : index
      %33 = vector.load %arg8[%c0_18, %c0_19] : memref<8x1xf32, #tpu.memory_space<vmem>>, vector<8x1xf32>
      tpu.vector_store %arg8[%c0_18, %c0_19], %28 {strides = array<i32>} : memref<8x1xf32, #tpu.memory_space<vmem>>, vector<8x1xf32>,
    } else {
    }
    %c1_i32 = arith.constant 1 : i32
    %24 = arith.cmpi eq, %arg1, %c1_i32 : i32
    %25 = arith.extui %24 : i1 to i32
    %c0_i32_11 = arith.constant 0 : i32
    %26 = arith.cmpi ne, %25, %c0_i32_11 : i32
    scf.if %26 {
      %c0_12 = arith.constant 0 : index
      %c0_13 = arith.constant 0 : index
      %27 = vector.load %arg7[%c0_12, %c0_13] : memref<8x1xf32, #tpu.memory_space<vmem>>, vector<8x1xf32>
      %28 = vector.broadcast %27 : vector<8x1xf32> to vector<8x128xf32>
      %29 = arith.subf %10, %28 : vector<8x128xf32>
      %30 = math.exp %29 : vector<8x128xf32>
      %c0_14 = arith.constant 0 : index
      %c0_15 = arith.constant 0 : index
      %31 = vector.load %arg8[%c0_14, %c0_15] : memref<8x1xf32, #tpu.memory_space<vmem>>, vector<8x1xf32>
      %32 = vector.broadcast %31 : vector<8x1xf32> to vector<8x128xf32>
      %33 = arith.mulf %30, %32 : vector<8x128xf32>
      %c0_16 = arith.constant 0 : index
      %c0_17 = arith.constant 0 : index
      %34 = vector.load %arg6[%c0_16, %c0_17] : memref<8x128xf32, #tpu.memory_space<vmem>>, vector<8x128xf32>
      tpu.vector_store %arg6[%c0_16, %c0_17], %33 {strides = array<i32>} : memref<8x128xf32, #tpu.memory_space<vmem>>, vector<8x128xf32>,
    } else {
    }
    return
  }
  func.func @transform_0(%arg0: i32, %arg1: i32, %arg2: i32) -> (i32, i32) {
    %c0_i32 = arith.constant 0 : i32
    %c0_i32_0 = arith.constant 0 : i32
    return %arg0, %c0_i32 : i32, i32
  }
  func.func @transform_1(%arg0: i32, %arg1: i32, %arg2: i32) -> (i32, i32) {
    %c0_i32 = arith.constant 0 : i32
    %c0_i32_0 = arith.constant 0 : i32
    return %arg2, %c0_i32 : i32, i32
  }
  func.func @transform_2(%arg0: i32, %arg1: i32, %arg2: i32) -> (i32, i32) {
    %c0_i32 = arith.constant 0 : i32
    %c0_i32_0 = arith.constant 0 : i32
    return %arg0, %c0_i32 : i32, i32
  }
  func.func @transform_3(%arg0: i32, %arg1: i32, %arg2: i32) -> (i32, i32) {
    %0 = arith.muli %arg2, %arg1 : i32
    %c0_i32 = arith.constant 0 : i32
    return %arg0, %0 : i32, i32
  }
}

</mosaic_0001>

<bundles_post_ra>
// kernel: tpu_custom_call.1
= control target key start
LH: loop header
LB: loop body
LE: loop exit
PB: predicated region body
PF: predicated region fallthrough
CT: control target
= control target key end

     0   :  { %9 = vsyncpa [#allocation5], 0  ;;  %s1204_s0 = inlined_call_operand.vmem [shape: f32[8,32], index: 0, kind: input, shape index: {}]   ;;  %s1205_s1 = inlined_call_operand.vmem [shape: f32[128,32], index: 1, kind: input, shape index: {}]   ;;  %s1206_s2 = inlined_call_operand.hbm [shape: f32[8,32], index: 2, kind: output, shape index: {0}]   ;;  %s1207_s3 = inlined_call_operand.hbm [shape: f32[8,128], index: 3, kind: output, shape index: {1}]  }
   0x1   :  { %10 = vsyncpa [#allocation7], 0 }
   0x2   :  { %12 = vsyncpa [#allocation7 + $0x1], 0  ;;  %s1021_s12 = smov 0   ;;  %s1023_s13 = smov 0  }
   0x3   :  { %s1025_s14 = smov 0  }
   0x4 LB: > { %s645_s15 = sadd.s32 4294967295, %s986_s14   ;;  %s646_s16 = sadd.s32 4294967294, %s986_s14   ;;  %s986_s14 = sphi %s1025_s14, %s18_s14   ;;  %s982_s13 = sphi %s1023_s13, %s1212_s13   ;;  %s978_s12 = sphi %s1021_s12, %s1211_s12  }
   0x5   : > { %s33_s17 = sadd.s32 1, %s982_s13  ;;  %p650_p0 = scmp.ge.s32.totalorder %s986_s14, 1 }
   0x6   : > { %p35_p1 = scmp.ge.s32.totalorder %s33_s17, 2  ;;  %p177_p2 = scmp.lt.s32.totalorder %s986_s14, 3 }
   0x8   : > { %s1214_s17 = smov (%p35_p1, %s33_s17), 0  ;;  %p178_p3 = pnand %p650_p0, %p177_p2 }
   0x9   : > { %v217_v0 = vld [vmem:[%s1205_s1] sm:$0xff] (!%p178_p3)  ;;  %v218_v1 = vld [vmem:[%s1205_s1 + $0x8] sm:$0xff] (!%p178_p3)  ;;  %vm233_vm0 = vcmask (!%p178_p3), 261120   ;;  %v988_v2 = vmov (!%p178_p3), 0.0|0.0   ;;  %vm989_vm2 = vmmov (!%p178_p3), 0   ;;  %v990_v5 = vmov (!%p178_p3), 0.0  }
   0xa   : > { %181 = sbr.rel (%p178_p3) target bundleno = 1129 (0x469), region = 28  ;;  %782 = vmatprep.subr.bf16.mxu0 (!%p178_p3), %v988_v2  ;;  %v1049_v3 = vpack.c.bf16 (!%p178_p3), %v218_v1, %v217_v0  ;;  %vm1053_vm1 = vmpackc.low (!%p178_p3), %vm233_vm0, %vm233_vm0  ;;  %744 = vmatprep.mubr.msk.f32.mxu0 (!%p178_p3), %vm989_vm2, %v990_v5  ;;  %v219_v6 = vld [vmem:[%s1205_s1 + $0x10] sm:$0xff] (!%p178_p3)  ;;  %v220_v7 = vld [vmem:[%s1205_s1 + $0x18] sm:$0xff] (!%p178_p3)  ;;  %p362_p4 = scmp.eq.s32.totalorder (!%p178_p3), %s978_s12, 0  ;;  %v356_v28 = vlaneseq (!%p178_p3) }
   0xb   : > { %v787_v8 = vpack.c.bf16 (!%p178_p3), %v220_v7, %v219_v6  ;;  %v221_v9 = vld [vmem:[%s1205_s1 + $0x20] sm:$0xff] (!%p178_p3)  ;;  %v222_v10 = vld [vmem:[%s1205_s1 + $0x28] sm:$0xff] (!%p178_p3)  ;;  %v223_v12 = vld [vmem:[%s1205_s1 + $0x30] sm:$0xff] (!%p178_p3) }
   0xc   : > { %785 = vmatpush3.bf16.xpose.msk.msra.mxu0 (!%p178_p3), %vm1053_vm1, %v1049_v3  ;;  %v791_v11 = vpack.c.bf16 (!%p178_p3), %v222_v10, %v221_v9  ;;  %v224_v13 = vld [vmem:[%s1205_s1 + $0x38] sm:$0xff] (!%p178_p3)  ;;  %v225_v15 = vld [vmem:[%s1205_s1 + $0x40] sm:$0xff] (!%p178_p3)  ;;  %v226_v16 = vld [vmem:[%s1205_s1 + $0x48] sm:$0xff] (!%p178_p3)  ;;  %v357_v29 = vand.u32 (!%p178_p3), 127, %v356_v28 }
   0xd   : > { %786 = vmatprep.subr.bf16.mxu0 (!%p178_p3), %v988_v2  ;;  %v795_v14 = vpack.c.bf16 (!%p178_p3), %v224_v13, %v223_v12  ;;  %v799_v17 = vpack.c.bf16 (!%p178_p3), %v226_v16, %v225_v15  ;;  %v227_v18 = vld [vmem:[%s1205_s1 + $0x50] sm:$0xff] (!%p178_p3)  ;;  %v228_v19 = vld [vmem:[%s1205_s1 + $0x58] sm:$0xff] (!%p178_p3)  ;;  %v229_v21 = vld [vmem:[%s1205_s1 + $0x60] sm:$0xff] (!%p178_p3) }
   0xe   : > { %v803_v20 = vpack.c.bf16 (!%p178_p3), %v228_v19, %v227_v18  ;;  %v230_v22 = vld [vmem:[%s1205_s1 + $0x68] sm:$0xff] (!%p178_p3)  ;;  %v231_v24 = vld [vmem:[%s1205_s1 + $0x70] sm:$0xff] (!%p178_p3)  ;;  %v232_v25 = vld [vmem:[%s1205_s1 + $0x78] sm:$0xff] (!%p178_p3)  ;;  %vm360_vm3 = vcmp.lt.s32.totalorder (!%p178_p3), %v357_v29, 16 }
   0xf   : > { %v807_v23 = vpack.c.bf16 (!%p178_p3), %v230_v22, %v229_v21  ;;  %v811_v26 = vpack.c.bf16 (!%p178_p3), %v232_v25, %v231_v24  ;;  %v216_v27 = vld [vmem:[%s1204_s0] sm:$0xff] (!%p178_p3) }
  0x11   : > { %vm368_vm4 = vcmask (%p362_p4), 7168   ;;  %v991_v33 = vmov (%p362_p4), -1e+30   ;;  %v992_v34 = vmov (%p362_p4), 0.0  }
  0x12   : > { %369 = vst.msk [vmem:[#allocation2] sm:$0xff] (%p362_p4), %vm368_vm4, %v991_v33  ;;  %370 = vst.msk [vmem:[#allocation3] sm:$0xff] (%p362_p4), %vm368_vm4, %v992_v34 }
  0x13   : > { %371 = vst.msk [vmem:[#allocation4] sm:$0xff] (%p362_p4), %vm233_vm0, %v992_v34 }
  0x14   : > { %789 = vmatpush3.bf16.xpose.msk.msra.mxu0 %vm1053_vm1, %v787_v8 }
  0x15   : > { %790 = vmatprep.subr.bf16.mxu0 %v988_v2 }
  0x1c   : > { %793 = vmatpush3.bf16.xpose.msk.msra.mxu0 %vm1053_vm1, %v791_v11 }
  0x1d   : > { %794 = vmatprep.subr.bf16.mxu0 %v988_v2 }
  0x24   : > { %797 = vmatpush3.bf16.xpose.msk.msra.mxu0 %vm1053_vm1, %v795_v14 }
  0x25   : > { %798 = vmatprep.subr.bf16.mxu0 %v988_v2 }
  0x2c   : > { %801 = vmatpush3.bf16.xpose.msk.msra.mxu0 %vm1053_vm1, %v799_v17 }
  0x2d   : > { %802 = vmatprep.subr.bf16.mxu0 %v988_v2 }
  0x34   : > { %805 = vmatpush3.bf16.xpose.msk.msra.mxu0 %vm1053_vm1, %v803_v20 }
  0x35   : > { %806 = vmatprep.subr.bf16.mxu0 %v988_v2 }
  0x3c   : > { %809 = vmatpush3.bf16.xpose.msk.msra.mxu0 %vm1053_vm1, %v807_v23 }
  0x3d   : > { %810 = vmatprep.subr.bf16.mxu0 %v988_v2 }
  0x44   : > { %813 = vmatpush3.bf16.xpose.msk.msra.mxu0 %vm1053_vm1, %v811_v26 }
  0x4b   : > { %745 = vmatmul.mubr.msk.f32.vlgmr.msra.gmra.mrb[0].mxu0 %vm233_vm0, %v216_v27 }
 0x119   : > { %367 = sbr.rel (!%p362_p4) target bundleno = 288 (0x120), region = 32 }
 0x11e   : > { %v351_v30 = vpop.f32.mrb[0].mxu0 }
 0x11f   : > { %v1121_v31 = vsel %vm360_vm3, %v351_v30, -1e+30  ;;  %v746_v32 = vpop.f32.mrb[1].mxu0 }
 0x120 PF: > { %p669_p5 = scmp.ne.s32.totalorder %s978_s12, 0 }
 0x121   : > { %376 = vmax.xlane.f32.xlu0 (!%p669_p5), %v1121_v31  ;;  %v993_v35 = vmov (!%p669_p5), 0   ;;  %v994_v36 = vmov (!%p669_p5), 0.0|0.0   ;;  %v375_v37 = vld [vmem:[#allocation2] sm:$0xff] (!%p669_p5)  ;;  %vm395_vm5 = vcmask (!%p669_p5), 7168   ;;  %vm995_vm6 = vmmov (!%p669_p5), 0   ;;  %v390_v48 = vld [vmem:[#allocation3] sm:$0xff] (!%p669_p5) }
 0x122   : > { %374 = sbr.rel (%p669_p5) target bundleno = 791 (0x317), region = 36  ;;  %892 = vset.pattern.permute.xlu0 (!%p669_p5), %v993_v35  ;;  %893 = vset.pattern.permute.xlu1 (!%p669_p5), %v993_v35  ;;  %v996_v41 = vmov (!%p669_p5), 0.0   ;;  %v397_v52 = vld [vmem:[#allocation4] sm:$0xff] (!%p669_p5) }
 0x123   : > { %814 = vmatprep.subr.bf16.mxu0 (!%p669_p5), %v994_v36  ;;  %779 = vmatprep.mubr.msk.f32.mxu0 (!%p669_p5), %vm995_vm6, %v996_v41 }
 0x124   : > { %816 = vmatpush3.bf16.msra.mxu0 (!%p669_p5), %v1049_v3 }
 0x125   : > { %817 = vmatprep.subr.bf16.mxu0 (!%p669_p5), %v994_v36 }
 0x128   : > { %819 = vmatpush3.bf16.msra.mxu0 (!%p669_p5), %v787_v8 }
 0x129   : > { %820 = vmatprep.subr.bf16.mxu0 %v994_v36 }
 0x12c   : > { %822 = vmatpush3.bf16.msra.mxu0 %v791_v11 }
 0x12d   : > { %823 = vmatprep.subr.bf16.mxu0 %v994_v36 }
 0x130   : > { %825 = vmatpush3.bf16.msra.mxu0 %v795_v14 }
 0x131   : > { %826 = vmatprep.subr.bf16.mxu0 %v994_v36 }
 0x134   : > { %828 = vmatpush3.bf16.msra.mxu0 %v799_v17 }
 0x135   : > { %829 = vmatprep.subr.bf16.mxu0 %v994_v36 }
 0x138   : > { %831 = vmatpush3.bf16.msra.mxu0 %v803_v20 }
 0x139   : > { %832 = vmatprep.subr.bf16.mxu0 %v994_v36 }
 0x13c   : > { %834 = vmatpush3.bf16.msra.mxu0 %v807_v23 }
 0x13d   : > { %835 = vmatprep.subr.bf16.mxu0 %v994_v36 }
 0x140   : > { %837 = vmatpush3.bf16.msra.mxu0 %v811_v26 }
 0x1ae   : > { %v377_v38 = vpop.xlane.xlu0 %376 }
 0x1af   : > { %v378_v39 = vmax.f32 %v375_v37, %v377_v38 }
 0x1b1   : > { %v379_v40 = vsub.f32 %v375_v37, %v378_v39  ;;  %476 = vst.msk [vmem:[#allocation2] sm:$0xff] %vm395_vm5, %v378_v39  ;;  %384 = vperm.xlu0 %892, %v378_v39  }
 0x1b3   : > { %v380_v46 = vmul.f32 1.442695, %v379_v40 }
 0x230   : > { %v385_v42 = vpop.permute.xlu0 %384 }
 0x231   : > { %v387_v43 = vsub.f32 %v1121_v31, %v385_v42 }
 0x233   : > { %v388_v44 = vmul.f32 1.442695, %v387_v43 }
 0x235   : > { %894 = vpow2.f32 %v388_v44 }
 0x236   : > { %896 = vpow2.f32 %v380_v46 }
 0x23f   : > { %v895_v45 = vpop.eup %894 }
 0x240   : > { %392 = vadd.xlane.f32.xlu1 %v895_v45  ;;  %780 = vmatmul.mubr.f32.vlgmr.msra.gmra.mrb[0].mxu0 %v895_v45  ;;  %v897_v47 = vpop.eup %896 }
 0x241   : > { %v391_v49 = vmul.f32 %v897_v47, %v390_v48 }
 0x251   : > { %400 = vperm.xlu1 %893, %v897_v47  }
 0x2cd   : > { %v393_v50 = vpop.xlane.xlu1 %392 }
 0x2ce   : > { %v394_v51 = vadd.f32 %v393_v50, %v391_v49 }
 0x2d0   : > { %396 = vst.msk [vmem:[#allocation3] sm:$0xff] %vm395_vm5, %v394_v51 }
 0x2d1   : > { %v401_v53 = vpop.permute.xlu1 %400 }
 0x2d2   : > { %v403_v54 = vmul.f32 %v401_v53, %v397_v52 }
 0x313   : > { %v470_v55 = vpop.f32.mrb[0].mxu0 }
 0x314   : > { %v474_v56 = vadd.f32 %v470_v55, %v403_v54  ;;  %v781_v57 = vpop.f32.mrb[1].mxu0 }
 0x316   : > { %475 = vst.msk [vmem:[#allocation4] sm:$0xff] %vm233_vm0, %v474_v56 }
 0x317 PF: > { %478 = sbr.rel (!%p362_p4) target bundleno = 934 (0x3a6), region = 40  ;;  %v479_v58 = vld [vmem:[#allocation3] sm:$0xff] (%p362_p4)  ;;  %v997_v59 = vmov (%p362_p4), 0   ;;  %vm489_vm7 = vcmask (%p362_p4), 7168  }
 0x318   : > { %898 = vset.pattern.permute.xlu0 (%p362_p4), %v997_v59  ;;  %899 = vrcp.f32 (%p362_p4), %v479_v58 }
 0x31d   : > { %v481_v61 = vld [vmem:[#allocation4] sm:$0xff] (%p362_p4) }
 0x322   : > { %v900_v60 = vpop.eup %899 }
 0x323   : > { %484 = vperm.xlu0 %898, %v900_v60   ;;  %490 = vst.msk [vmem:[#allocation3] sm:$0xff] %vm489_vm7, %v900_v60 }
 0x3a2   : > { %v485_v62 = vpop.permute.xlu0 %484 }
 0x3a3   : > { %v487_v63 = vmul.f32 %v485_v62, %v481_v61 }
 0x3a5   : > { %488 = vst.msk [vmem:[#allocation4] sm:$0xff] %vm233_vm0, %v487_v63 }
 0x3a6 PF: > { %p670_p6 = scmp.ne.s32.totalorder %s978_s12, 1 }
 0x3a7   : > { %v495_v0 = vld [vmem:[#allocation2] sm:$0xff] (!%p670_p6)  ;;  %v998_v1 = vmov (!%p670_p6), 0   ;;  %v504_v2 = vld [vmem:[#allocation3] sm:$0xff] (!%p670_p6) }
 0x3a8   : > { %494 = sbr.rel (%p670_p6) target bundleno = 1083 (0x43b), region = 44  ;;  %901 = vset.pattern.permute.xlu0 (!%p670_p6), %v998_v1 }
 0x3a9   : > { %498 = vperm.xlu0 (!%p670_p6), %901, %v495_v0  }
 0x3ad   : > { %507 = vperm.xlu0 (!%p670_p6), %901, %v504_v2  }
 0x428   : > { %v499_v3 = vpop.permute.xlu0 %498 }
 0x429   : > { %v501_v4 = vsub.f32 %v1121_v31, %v499_v3 }
 0x42b   : > { %v502_v5 = vmul.f32 1.442695, %v501_v4 }
 0x42c   : > { %v508_v7 = vpop.permute.xlu0 %507 }
 0x42d   : > { %902 = vpow2.f32 %v502_v5 }
 0x437   : > { %v903_v6 = vpop.eup %902 }
 0x438   : > { %v510_v8 = vmul.f32 %v903_v6, %v508_v7 }
 0x43a   : > { %511 = vst [vmem:[#allocation6] sm:$0xff] %v510_v8 }
 0x43b PF: > { %p1140_p7 = scmp.eq.s32.totalorder %s645_s15, 1  ;;  %s999_s4 = smov [#allocation4]  }
 0x43c   : > { %s526_s5 = sshll.u32 %s999_s4, 4  ;;  %s1000_s6 = smov [#allocation6]   ;;  %s527_s5 = int_to_ptr.vmem [resolvable:$true] %s526_s5 }
 0x43d   : > { %s541_s7 = sshll.u32 %s1000_s6, 4  ;;  %s904_s8 = scalar_lea.vmem %s527_s5, 128  ;;  %s1144_s7 = int_to_ptr.vmem [resolvable:$true] %s541_s7 }
 0x43e   : > { %p905_p8 = scmp.ne.s32.totalorder %s527_s5, %s904_s8  ;;  %p911_p11 = scmp.lt.s32.totalorder %s527_s5, %s527_s5 }
 0x43f   : > { %p912_p12 = scmp.lt.s32.totalorder %s904_s8, %s904_s8 }
 0x440   : > { %p906_p9 = pnand %p905_p8, %p1140_p7 }
 0x441   : > { %p913_p13 = por %p912_p12, %p911_p11 }
 0x442   : > { %p907_p10 = pneg %p906_p9 }
 0x444   : > { %p914_p0 = pnand %p913_p13, %p907_p10 }
 0x446   : > { %917 = shalt.err (!%p914_p0)
}
 0x447   : > { %s918_s10 = scalar_lea.hbm %s1206_s2, 128 }
 0x448   : > { %p919_p1 = scmp.ne.s32.totalorder %s1206_s2, %s918_s10  ;;  %p924_p4 = scmp.lt.u32.totalorder %s918_s10, %s1206_s2 }
 0x44a   : > { %p920_p2 = pnand %p919_p1, %p1140_p7 }
 0x44c   : > { %p921_p3 = pneg %p920_p2 }
 0x44e   : > { %p926_p5 = pnand %p924_p4, %p921_p3 }
 0x450   : > { %929 = shalt.err (!%p926_p5)
}
 0x451   : > { %839 = dma.vmem_to_hbm [thread:$0]  (%p1140_p7), %s527_s5, 128, %s1206_s2, [#allocation5]  }
 0x452   : > { %s930_s23 = scalar_lea.vmem %s1144_s7, 128  ;;  %s936_s24 = scalar_lea.vmem %s1144_s7, 256 }
 0x453   : > { %p931_p6 = scmp.ne.s32.totalorder %s1144_s7, %s930_s23  ;;  %p937_p10 = scmp.lt.s32.totalorder %s1144_s7, %s1144_s7 }
 0x454   : > { %p938_p11 = scmp.lt.s32.totalorder %s936_s24, %s930_s23 }
 0x455   : > { %p932_p8 = pnand %p931_p6, %p1140_p7 }
 0x456   : > { %p939_p12 = por %p938_p11, %p937_p10 }
 0x457   : > { %p933_p9 = pneg %p932_p8 }
 0x459   : > { %p940_p13 = pnand %p939_p12, %p933_p9 }
 0x45b   : > { %943 = shalt.err (!%p940_p13)
}
 0x45c   : > { %s944_s27 = scalar_lea.hbm %s1207_s3, 128 }
 0x45d   : > { %p945_p0 = scmp.ne.s32.totalorder %s1207_s3, %s944_s27  ;;  %p950_p3 = scmp.lt.u32.totalorder %s944_s27, %s1207_s3 }
 0x45f   : > { %p946_p1 = pnand %p945_p0, %p1140_p7 }
 0x461   : > { %p947_p2 = pneg %p946_p1 }
 0x463   : > { %p952_p4 = pnand %p950_p3, %p947_p2 }
 0x465   : > { %955 = shalt.err (!%p952_p4)
}
 0x466   : > { %841 = dma.vmem_to_hbm [thread:$0]  (%p1140_p7), %s1144_s7, 128, %s1207_s3, [#allocation7]  }
 0x467   : > { %969 = dma.done.wait (%p1140_p7), [#allocation5], 128  }
 0x468   : > { %971 = vsyncadd (%p1140_p7), [#allocation5], 4294967168 }
 0x469 PF: > { %p853_p5 = scmp.ge.s32.totalorder %s986_s14, 2  ;;  %p854_p6 = scmp.eq.s32.totalorder %s646_s16, 1 }
 0x46b   : > { %p847_p8 = pnand %p854_p6, %p853_p5 }
 0x46d   : > { %973 = dma.done.wait (!%p847_p8), [#allocation7], 128  }
 0x46e   : > { %975 = vsyncadd (!%p847_p8), [#allocation7], 4294967168  ;;  %s18_s14 = sadd.s32 1, %s986_s14   ;;  %s1211_s12 = smov %s982_s13 }
 0x46f   : > { %p15_p9 = scmp.ge.s32.totalorder %s18_s14, 4   ;;  %s1212_s13 = smov %s1214_s17 }
 0x471   :  { %17 = sbr.rel (!%p15_p9) target bundleno = 4 (0x4), region = 92 }
 0x478   :  { %563 = vsyncpa [#allocation5], 1 }
 0x479   :  { %565 = vsyncpa [#allocation5 + $0x1], 1 }
 0x47a   :  { %566 = vsyncpa [#allocation7], 1 }
 0x47b   :  { %568 = vsyncpa [#allocation7 + $0x1], 1 }

</bundles_post_ra>
